<compile_context>
chip_gen: v5e
topology: v5e:2x2
jax: 0.10.0
libtpu: 0.0.40
codegen_flags: <defaults>
</compile_context>

<pallas_src>
import jax
import jax.numpy as jnp
from jax.experimental import pallas as pl
from jax.experimental.pallas import tpu as pltpu


def _round_up(x, m):
    return ((x + m - 1) // m) * m


def _cdiv(a, b):
    return (a + b - 1) // b


def _make_head_kernel(hw_total, hw_chunk, nhw, mask_last):
    """Builds the head kernel for a fixed spatial-chunking configuration."""
    inv_hw = 1.0 / float(hw_total)

    def kernel(feats_ref, w1_ref, b1_ref, w2_ref, b2_ref, out_ref, acc_ref):
        j = pl.program_id(1)                       # spatial-chunk (reduction) step

        @pl.when(j == 0)
        def _init():
            acc_ref[...] = jnp.zeros_like(acc_ref)

        x = feats_ref[...]                         # (tb, C, hw_chunk), stream dtype
        if mask_last:
            # The trailing spatial chunk overhangs HW; its out-of-range columns
            # hold undefined data, so zero them before accumulating.
            valid = jnp.minimum(hw_total - j * hw_chunk, hw_chunk)
            col = jax.lax.broadcasted_iota(jnp.int32, x.shape, dimension=2)
            x = jnp.where(col < valid, x, jnp.zeros((), x.dtype))

        # Spatial (lane-axis) sum with f32 accumulation; the upcast stays inside
        # the reduction instead of materializing a full f32 tile.
        acc_ref[...] += jnp.sum(x, axis=-1, dtype=jnp.float32)      # (tb, C)

        @pl.when(j == nhw - 1)
        def _finalize():
            # AdaptiveAvgPool2d(1) + Flatten
            pooled = acc_ref[...] * inv_hw                           # (tb, C)
            # Linear(C -> 512) + ReLU, f32 accumulation on the MXU.
            h = jnp.dot(pooled, w1_ref[...],
                        preferred_element_type=jnp.float32) + b1_ref[...]
            h = jnp.maximum(h, 0.0)
            # Dropout(0.3): identity in eval mode.
            # TODO(synk): train-mode stochastic dropout not implemented.
            # Linear(512 -> NC_PAD): lane-dense (128-padded) store.
            out_ref[...] = jnp.dot(h, w2_ref[...],
                                   preferred_element_type=jnp.float32) + b2_ref[...]

    return kernel


def efficientnet_classifier_head(feats_nchw, w1, b1, w2, b2, *,
                                 vmem_budget_bytes=None):
    """EfficientNetClassifier head (avg-pool + MLP) on a backbone feature map.

    feats_nchw: (B, C, H, W) backbone feature map (PyTorch NCHW layout). It is
      streamed through the kernel in its own dtype (pass bf16 features from the
      backbone to halve the dominant HBM traffic); pooling/matmuls accumulate
      in f32.
    w1: (C, hidden), b1: (hidden,), w2: (hidden, num_classes), b2: (num_classes,)
    vmem_budget_bytes: optional per-step VMEM budget override (testing/tuning);
      by default derived from the running chip's VMEM capacity.
    """
    B, C, H, W = feats_nchw.shape
    HW = H * W
    hidden = w1.shape[1]
    num_classes = w2.shape[1]
    itemsize = jnp.dtype(feats_nchw.dtype).itemsize

    # NCHW -> (B, C, HW): metadata-only reshape, no relayout / extra HBM pass.
    feats = feats_nchw.reshape(B, C, HW)

    # Pad the classifier output to a full 128-lane slab; real classes are
    # sliced off after the kernel.  Weight padding is tiny.
    NC_PAD = _round_up(max(num_classes, 1), 128)
    w1 = w1.astype(jnp.float32)
    b1 = b1.astype(jnp.float32).reshape(1, hidden)
    w2p = jnp.zeros((hidden, NC_PAD), jnp.float32).at[:, :num_classes].set(
        w2.astype(jnp.float32))
    b2p = jnp.zeros((1, NC_PAD), jnp.float32).at[:, :num_classes].set(
        b2.astype(jnp.float32))

    # ---- Generation-aware VMEM budget (v5e/v6e: 128 MiB, v7x: 64 MiB) -------
    try:
        vmem_cap = int(pltpu.get_tpu_info().vmem_capacity_bytes)
    except Exception:
        vmem_cap = 64 << 20                      # conservative (v7x-sized) fallback
    if vmem_budget_bytes is None:
        vmem_budget_bytes = int(vmem_cap * 0.60)  # ~77 MiB v5e/v6e, ~38 MiB v7x

    weight_bytes = (C * hidden + hidden + hidden * NC_PAD + NC_PAD) * 4
    fixed_bytes = 2 * weight_bytes + (4 << 20)    # double-buffered weights + slack
    avail = max(vmem_budget_bytes - fixed_bytes, 4 << 20)

    # Per-batch-row bytes that do not scale with the spatial chunk: output
    # block (double-buffered), f32 pool accumulator, matmul intermediates.
    row_misc = 4 * (3 * NC_PAD + 2 * C + hidden)

    def _masked(hw):
        return hw != HW and (HW % hw) != 0

    def _feats_bytes(tb, hw):
        b = 2 * tb * C * hw * itemsize            # double-buffered input stream
        if itemsize < 4:
            b += tb * C * hw * 4                  # f32 upcast inside the reduce
        if _masked(hw):
            b += tb * C * hw * itemsize           # where-mask temporary
        return b

    def _usage(tb, hw):
        return tb * row_misc + _feats_bytes(tb, hw)

    # ---- Tile sizing ---------------------------------------------------------
    # Cap tb at ceil(B/2) so there are always >=2 batch tiles when B > 1: the
    # "parallel" batch axis then really shards across v7x's two TensorCores
    # (a harmless extra grid step on single-core v5e/v6e).
    tb_hi = _cdiv(B, 2) if B > 1 else 1
    tb = max(1, min(tb_hi, avail // max(1, _usage(1, HW))))
    hw_chunk = HW                                 # preferred: one spatial step
    if _usage(tb, HW) > avail and HW > 128:
        # Full-HW rows do not fit even at tb == 1: chunk the spatial axis and
        # reduce across a grid axis (per-step VMEM independent of HW).
        tb = min(tb_hi, 8)
        hw_chunk = 128
        while hw_chunk + 128 < HW and _usage(tb, hw_chunk + 128) <= avail:
            hw_chunk += 128
    while tb > 1 and _usage(tb, hw_chunk) > avail:
        tb -= 1
    if tb >= 8:
        tb = (tb // 8) * 8                        # sublane-aligned batch tiles

    nb = _cdiv(B, tb)
    nhw = _cdiv(HW, hw_chunk)

    vmem_limit = int(2 * weight_bytes + _usage(tb, hw_chunk) + (6 << 20))
    vmem_limit = int(min(max(vmem_limit, 16 << 20), int(vmem_cap * 0.70)))

    kernel = _make_head_kernel(HW, hw_chunk, nhw, _masked(hw_chunk))

    out3 = pl.pallas_call(
        kernel,
        out_shape=jax.ShapeDtypeStruct((nb, tb, NC_PAD), jnp.float32),
        grid_spec=pltpu.PrefetchScalarGridSpec(
            num_scalar_prefetch=0,
            grid=(nb, nhw),                       # batch (parallel), HW (reduction)
            in_specs=[
                # feats streamed per (batch-tile, spatial-chunk); the last batch
                # tile may overhang B -- Pallas clamps the DMA and the extra
                # rows only produce discarded output rows.
                pl.BlockSpec((tb, C, hw_chunk), lambda i, j: (i, 0, j)),
                # Weights / biases: constant block index -> VMEM-resident.
                pl.BlockSpec((C, hidden), lambda i, j: (0, 0)),
                pl.BlockSpec((1, hidden), lambda i, j: (0, 0)),
                pl.BlockSpec((hidden, NC_PAD), lambda i, j: (0, 0)),
                pl.BlockSpec((1, NC_PAD), lambda i, j: (0, 0)),
            ],
            out_specs=pl.BlockSpec((None, tb, NC_PAD), lambda i, j: (i, 0, 0)),
            scratch_shapes=[pltpu.VMEM((tb, C), jnp.float32)],
        ),
        compiler_params=pltpu.CompilerParams(
            dimension_semantics=("parallel", "arbitrary"),
            vmem_limit_bytes=vmem_limit,
        ),
    )(feats, w1, b1, w2p, b2p)

    return out3.reshape(nb * tb, NC_PAD)[:B, :num_classes]


def _init_linear(key, fan_in, fan_out):
    # Deterministic stand-in for nn.Linear default init: U(-1/sqrt(fan_in), ..)
    kw, kb = jax.random.split(key)
    bound = 1.0 / jnp.sqrt(jnp.float32(fan_in))
    w = jax.random.uniform(kw, (fan_in, fan_out), jnp.float32, -bound, bound)
    b = jax.random.uniform(kb, (fan_out,), jnp.float32, -bound, bound)
    return w, b


if __name__ == "__main__":
    # Small synthetic shapes consistent with the head:
    #   eff_ch -> 64 (stand-in for the real 640), hidden = 512, num_classes = 5
    B, C, H, W = 2, 64, 8, 8
    HIDDEN, NUM_CLASSES = 512, 5

    key = jax.random.PRNGKey(0)
    k_feats, k_l1, k_l2 = jax.random.split(key, 3)

    feats = jax.random.normal(k_feats, (B, C, H, W), jnp.float32)  # backbone output, NCHW
    w1, b1 = _init_linear(k_l1, C, HIDDEN)
    w2, b2 = _init_linear(k_l2, HIDDEN, NUM_CLASSES)

    def reference(f):
        pooled = f.astype(jnp.float32).reshape(B, C, -1).mean(-1)
        h = jnp.maximum(
            jnp.dot(pooled, w1, precision=jax.lax.Precision.HIGHEST) + b1, 0.0)
        return jnp.dot(h, w2, precision=jax.lax.Precision.HIGHEST) + b2

    ref = reference(feats)

    # f32 feats: eval-mode semantics of the original module.
    out = jax.block_until_ready(efficientnet_classifier_head(feats, w1, b1, w2, b2))
    assert out.shape == (B, NUM_CLASSES)
    assert jnp.allclose(out, ref, atol=5e-3, rtol=5e-3)

    # bf16 feats as produced by a bf16 backbone (halves the dominant HBM stream).
    out_bf16 = jax.block_until_ready(
        efficientnet_classifier_head(feats.astype(jnp.bfloat16), w1, b1, w2, b2))
    assert out_bf16.shape == (B, NUM_CLASSES)
    assert jnp.allclose(out_bf16, ref, atol=2e-2, rtol=2e-2)

    # Larger spatial map + tiny VMEM budget: exercises the chunked spatial
    # reduction grid axis and the trailing-chunk mask path.
    H2 = W2 = 96
    feats_big = jax.random.normal(jax.random.PRNGKey(1), (B, C, H2, W2), jnp.float32)
    ref_big = reference(feats_big)
    out_big = jax.block_until_ready(
        efficientnet_classifier_head(feats_big, w1, b1, w2, b2,
                                     vmem_budget_bytes=8 << 20))
    assert out_big.shape == (B, NUM_CLASSES)
    assert jnp.allclose(out_big, ref_big, atol=5e-3, rtol=5e-3)

    print("KERNEL_OK")
</pallas_src>

<mosaic_0001>
module attributes {stable_mosaic.version = 11 : i64} {
  func.func @kernel(%arg0: i32, %arg1: i32, %arg2: memref<1x64x64xf32, #tpu.memory_space<vmem>>, %arg3: memref<64x512xf32, #tpu.memory_space<vmem>>, %arg4: memref<1x512xf32, #tpu.memory_space<vmem>>, %arg5: memref<512x128xf32, #tpu.memory_space<vmem>>, %arg6: memref<1x128xf32, #tpu.memory_space<vmem>>, %arg7: memref<1x1x128xf32, #tpu.memory_space<vmem>>, %arg8: memref<1x64xf32, #tpu.memory_space<vmem>>) attributes {dimension_semantics = [#tpu.dimension_semantics<parallel>, #tpu.dimension_semantics<arbitrary>], iteration_bounds = array<i64: 2, 1>, scalar_prefetch = 0 : i64, scratch_operands = 1 : i64, tpu.core_type = #tpu.core_type<tc>, window_params = [{transform_indices = @transform_0, window_bounds = array<i64: 1, 64, 64>}, {pipeline_mode = #tpu.pipeline_mode<synchronous>, transform_indices = @transform_1, window_bounds = array<i64: 64, 512>}, {pipeline_mode = #tpu.pipeline_mode<synchronous>, transform_indices = @transform_2, window_bounds = array<i64: 1, 512>}, {pipeline_mode = #tpu.pipeline_mode<synchronous>, transform_indices = @transform_3, window_bounds = array<i64: 512, 128>}, {pipeline_mode = #tpu.pipeline_mode<synchronous>, transform_indices = @transform_4, window_bounds = array<i64: 1, 128>}, {transform_indices = @transform_5, window_bounds = array<i64: 1, 1, 128>}]} {
    %c0_i32 = arith.constant 0 : i32
    %0 = arith.cmpi eq, %arg1, %c0_i32 : i32
    %1 = arith.extui %0 : i1 to i32
    %c0_i32_0 = arith.constant 0 : i32
    %2 = arith.cmpi ne, %1, %c0_i32_0 : i32
    scf.if %2 {
      %cst_9 = arith.constant 0.000000e+00 : f32
      %11 = vector.broadcast %cst_9 : f32 to vector<1x64xf32>
      %c0_10 = arith.constant 0 : index
      %c0_11 = arith.constant 0 : index
      %12 = vector.load %arg8[%c0_10, %c0_11] : memref<1x64xf32, #tpu.memory_space<vmem>>, vector<1x64xf32>
      tpu.vector_store %arg8[%c0_10, %c0_11], %11 {strides = array<i32>} : memref<1x64xf32, #tpu.memory_space<vmem>>, vector<1x64xf32>,
    } else {
    }
    %c0 = arith.constant 0 : index
    %c0_1 = arith.constant 0 : index
    %c0_2 = arith.constant 0 : index
    %3 = vector.load %arg2[%c0, %c0_1, %c0_2] : memref<1x64x64xf32, #tpu.memory_space<vmem>>, vector<1x64x64xf32>
    %c0_3 = arith.constant 0 : index
    %c0_4 = arith.constant 0 : index
    %4 = vector.load %arg8[%c0_3, %c0_4] : memref<1x64xf32, #tpu.memory_space<vmem>>, vector<1x64xf32>
    %cst = arith.constant dense<0.000000e+00> : vector<1x64xf32>
    %5 = vector.multi_reduction <add>, %3, %cst [2] : vector<1x64x64xf32> to vector<1x64xf32>
    %6 = arith.addf %4, %5 : vector<1x64xf32>
    %c0_5 = arith.constant 0 : index
    %c0_6 = arith.constant 0 : index
    %7 = vector.load %arg8[%c0_5, %c0_6] : memref<1x64xf32, #tpu.memory_space<vmem>>, vector<1x64xf32>
    tpu.vector_store %arg8[%c0_5, %c0_6], %6 {strides = array<i32>} : memref<1x64xf32, #tpu.memory_space<vmem>>, vector<1x64xf32>,
    %c0_i32_7 = arith.constant 0 : i32
    %8 = arith.cmpi eq, %arg1, %c0_i32_7 : i32
    %9 = arith.extui %8 : i1 to i32
    %c0_i32_8 = arith.constant 0 : i32
    %10 = arith.cmpi ne, %9, %c0_i32_8 : i32
    scf.if %10 {
      %c0_9 = arith.constant 0 : index
      %c0_10 = arith.constant 0 : index
      %11 = vector.load %arg8[%c0_9, %c0_10] : memref<1x64xf32, #tpu.memory_space<vmem>>, vector<1x64xf32>
      %cst_11 = arith.constant 1.562500e-02 : f32
      %12 = vector.broadcast %cst_11 : f32 to vector<1x64xf32>
      %13 = arith.mulf %11, %12 : vector<1x64xf32>
      %c0_12 = arith.constant 0 : index
      %c0_13 = arith.constant 0 : index
      %14 = vector.load %arg3[%c0_12, %c0_13] : memref<64x512xf32, #tpu.memory_space<vmem>>, vector<64x512xf32>
      %cst_14 = arith.constant dense<0.000000e+00> : vector<1x512xf32>
      %15 = tpu.matmul %13, %14, %cst_14 {dimension_numbers = #tpu.dot_dimension_numbers<[1], [0], [0], [1], [0, 0, 1, 1], [], []>} : vector<1x64xf32>, vector<64x512xf32>, vector<1x512xf32> -> vector<1x512xf32>
      %c0_15 = arith.constant 0 : index
      %c0_16 = arith.constant 0 : index
      %16 = vector.load %arg4[%c0_15, %c0_16] : memref<1x512xf32, #tpu.memory_space<vmem>>, vector<1x512xf32>
      %17 = arith.addf %15, %16 : vector<1x512xf32>
      %cst_17 = arith.constant 0.000000e+00 : f32
      %18 = vector.broadcast %cst_17 : f32 to vector<1x512xf32>
      %19 = arith.maximumf %17, %18 : vector<1x512xf32>
      %c0_18 = arith.constant 0 : index
      %c0_19 = arith.constant 0 : index
      %20 = vector.load %arg5[%c0_18, %c0_19] : memref<512x128xf32, #tpu.memory_space<vmem>>, vector<512x128xf32>
      %cst_20 = arith.constant dense<0.000000e+00> : vector<1x128xf32>
      %21 = tpu.matmul %19, %20, %cst_20 {dimension_numbers = #tpu.dot_dimension_numbers<[1], [0], [0], [1], [0, 0, 1, 1], [], []>} : vector<1x512xf32>, vector<512x128xf32>, vector<1x128xf32> -> vector<1x128xf32>
      %c0_21 = arith.constant 0 : index
      %c0_22 = arith.constant 0 : index
      %22 = vector.load %arg6[%c0_21, %c0_22] : memref<1x128xf32, #tpu.memory_space<vmem>>, vector<1x128xf32>
      %23 = arith.addf %21, %22 : vector<1x128xf32>
      %c0_23 = arith.constant 0 : index
      %c0_24 = arith.constant 0 : index
      %c0_25 = arith.constant 0 : index
      %24 = vector.load %arg7[%c0_23, %c0_24, %c0_25] : memref<1x1x128xf32, #tpu.memory_space<vmem>>, vector<1x1x128xf32>
      %25 = vector.shape_cast %24 : vector<1x1x128xf32> to vector<1x128xf32>
      %26 = vector.shape_cast %23 : vector<1x128xf32> to vector<1x1x128xf32>
      tpu.vector_store %arg7[%c0_23, %c0_24, %c0_25], %26 {strides = array<i32>} : memref<1x1x128xf32, #tpu.memory_space<vmem>>, vector<1x1x128xf32>,
    } else {
    }
    return
  }
  func.func @transform_0(%arg0: i32, %arg1: i32) -> (i32, i32, i32) {
    %c0_i32 = arith.constant 0 : i32
    %c0_i32_0 = arith.constant 0 : i32
    return %arg0, %c0_i32, %arg1 : i32, i32, i32
  }
  func.func @transform_1(%arg0: i32, %arg1: i32) -> (i32, i32) {
    %c0_i32 = arith.constant 0 : i32
    %c0_i32_0 = arith.constant 0 : i32
    %c0_i32_1 = arith.constant 0 : i32
    return %c0_i32, %c0_i32_0 : i32, i32
  }
  func.func @transform_2(%arg0: i32, %arg1: i32) -> (i32, i32) {
    %c0_i32 = arith.constant 0 : i32
    %c0_i32_0 = arith.constant 0 : i32
    %c0_i32_1 = arith.constant 0 : i32
    return %c0_i32, %c0_i32_0 : i32, i32
  }
  func.func @transform_3(%arg0: i32, %arg1: i32) -> (i32, i32) {
    %c0_i32 = arith.constant 0 : i32
    %c0_i32_0 = arith.constant 0 : i32
    %c0_i32_1 = arith.constant 0 : i32
    return %c0_i32, %c0_i32_0 : i32, i32
  }
  func.func @transform_4(%arg0: i32, %arg1: i32) -> (i32, i32) {
    %c0_i32 = arith.constant 0 : i32
    %c0_i32_0 = arith.constant 0 : i32
    %c0_i32_1 = arith.constant 0 : i32
    return %c0_i32, %c0_i32_0 : i32, i32
  }
  func.func @transform_5(%arg0: i32, %arg1: i32) -> (i32, i32, i32) {
    %c0_i32 = arith.constant 0 : i32
    %c0_i32_0 = arith.constant 0 : i32
    %c0_i32_1 = arith.constant 0 : i32
    return %arg0, %c0_i32, %c0_i32_0 : i32, i32, i32
  }
}

</mosaic_0001>

<bundles_post_ra>
// kernel: tpu_custom_call.1
= control target key start
LH: loop header
LB: loop body
LE: loop exit
PB: predicated region body
PF: predicated region fallthrough
CT: control target
= control target key end

     0   :  { %s1548_s0 = inlined_call_operand.hbm [shape: f32[2,64,64], index: 0, kind: input, shape index: {}]   ;;  %s1549_s1 = inlined_call_operand.hbm [shape: f32[64,512], index: 1, kind: input, shape index: {}]   ;;  %s1550_s2 = inlined_call_operand.hbm [shape: f32[1,512], index: 2, kind: input, shape index: {}]   ;;  %s1551_s3 = inlined_call_operand.hbm [shape: f32[512,128], index: 3, kind: input, shape index: {}]   ;;  %s1552_s4 = inlined_call_operand.vmem [shape: f32[1,128], index: 4, kind: input, shape index: {}]   ;;  %s1553_s5 = inlined_call_operand.hbm [shape: f32[2,1,128], index: 5, kind: output, shape index: {}]  }
   0x1   :  { %1556 = sst [smem:[#allocation16_spill]] %s1549_s1 }
   0x2   :  { %1557 = sst [smem:[#allocation17_spill]] %s1550_s2 }
   0x3   :  { %1558 = sst [smem:[#allocation18_spill]] %s1551_s3 }
   0x4   :  { %10 = vsyncpa [#allocation4], 0 }
   0x5   :  { %12 = vsyncpa [#allocation4 + $0x1], 0 }
   0x6   :  { %13 = vsyncpa [#allocation7], 0 }
   0x7   :  { %14 = vsyncpa [#allocation10], 0 }
   0x8   :  { %15 = vsyncpa [#allocation5], 0 }
   0x9   :  { %17 = vsyncpa [#allocation5 + $0x1], 0  ;;  %s1330_s18 = smov 0   ;;  %s1332_s19 = smov 0  }
   0xa   :  { %s1334_s20 = smov 0   ;;  %s1336_s21 = smov 0  }
   0xb   :  { %s1338_s22 = smov 0   ;;  %s1340_s23 = smov 0  }
   0xc LB: > { %s955_s24 = sadd.s32 4294967295, %s1289_s23   ;;  %s956_s25 = sadd.s32 4294967294, %s1289_s23   ;;  %s1289_s23 = sphi %s1340_s23, %s23_s23   ;;  %s1285_s22 = sphi %s1338_s22, %s1576_s22   ;;  %s1281_s21 = sphi %s1336_s21, %s1575_s21   ;;  %s1277_s20 = sphi %s1334_s20, %s1574_s20   ;;  %s1273_s19 = sphi %s1332_s19, %s1573_s19   ;;  %s1269_s18 = sphi %s1330_s18, %s1572_s18  }
   0xd   : > { %p57_p0 = scmp.ne.s32.totalorder %s1273_s19, %s1269_s18  ;;  %p1364_p1 = scmp.eq.s32.totalorder %s955_s24, 0 }
   0xe   : > { %p1368_p2 = scmp.eq.s32.totalorder %s955_s24, 1  ;;  %p171_p3 = scmp.eq.s32.totalorder %s956_s25, 1 }
   0xf   : > { %p1374_p4 = por %p1364_p1, %p57_p0  ;;  %p957_p5 = scmp.ge.s32.totalorder %s1289_s23, 1 }
  0x10   : > { %p1379_p6 = por %p171_p3, %p57_p0  ;;  %p178_p7 = scmp.lt.s32.totalorder %s1289_s23, 3 }
  0x11   : > { %s1563_s1 = sld [smem:[#allocation16_spill]]  ;;  %s1291_s9 = smov [#allocation6]  }
  0x12   : > { %p1387_p8 = pnand %p957_p5, %p178_p7  ;;  %s191_s10 = sshll.u32 %s1291_s9, 4  ;;  %s192_s10 = int_to_ptr.vmem [resolvable:$true] %s191_s10 }
  0x13   : > { %p961_p11 = scmp.ge.s32.totalorder %s1289_s23, 2  ;;  %s1566_s2 = sld [smem:[#allocation17_spill]] }
  0x14   : > { %p993_p9 = pneg %p1387_p8  ;;  %s1292_s15 = smov 512  }
  0x15   : > { %s1293_s16 = smov 32   ;;  %s1294_s17 = smov [#allocation8]  }
  0x16   : > { %p1395_p10 = pnand %p993_p9, %p1364_p1  ;;  %s206_s24 = sshll.u32 %s1294_s17, 4  ;;  %s207_s24 = int_to_ptr.vmem [resolvable:$true] %s206_s24 }
  0x17   : > { %s189_s7 = sshll.u32 %s1563_s1, 4  ;;  %s1567_s3 = sld [smem:[#allocation18_spill]]  ;;  %s190_s7 = int_to_ptr.hbm [resolvable:$true] %s189_s7 }
  0x18   : > { %996 = dma.hbm_to_vmem [thread:$0]  (!%p1395_p10), %s190_s7, 4096, %s192_s10, [#allocation7], %s1292_s15, %s1292_s15, %s1293_s16  }
  0x19   : > { %s204_s14 = sshll.u32 %s1566_s2, 4  ;;  %s1295_s9 = smov [#allocation9]   ;;  %s205_s14 = int_to_ptr.hbm [resolvable:$true] %s204_s14 }
  0x1a   : > { %999 = dma.hbm_to_vmem [thread:$0]  (!%p1395_p10), %s205_s14, 64, %s207_s24, [#allocation7]  }
  0x1b   : > { %s217_s12 = sshll.u32 %s1295_s9, 4  ;;  %s1554_s13 = smov 128   ;;  %s218_s12 = int_to_ptr.vmem [resolvable:$true] %s217_s12 }
  0x1c   : > { %s1555_s7 = smov 8   ;;  %s44_s10 = sadd.s32 1, %s1277_s20 }
  0x1d   : > { %s215_s6 = sshll.u32 %s1567_s3, 4  ;;  %s35_s15 = sadd.s32 1, %s1285_s22  ;;  %s216_s6 = int_to_ptr.hbm [resolvable:$true] %s215_s6 }
  0x1e   : > { %1002 = dma.hbm_to_vmem [thread:$0]  (!%p1395_p10), %s216_s6, 8192, %s218_s12, [#allocation10], %s1554_s13, %s1554_s13, %s1555_s7  }
  0x1f   : > { %p51_p12 = scmp.ne.s32.totalorder %s1277_s20, %s1273_s19  ;;  %p37_p13 = scmp.ge.s32.totalorder %s35_s15, 2 }
  0x20   : > { %p52_p0 = scmp.eq.s32.totalorder %s1289_s23, 0  ;;  %p1014_p5 = scmp.lt.s32.totalorder %s1289_s23, 2 }
  0x21   : > { %p1422_p3 = por %p1368_p2, %p51_p12  ;;  %s1578_s15 = smov (%p37_p13, %s35_s15), 0 }
  0x22   : > { %p1429_p7 = por %p52_p0, %p51_p12  ;;  %s234_s16 = sand.u32 1, %s1277_s20  }
  0x23   : > { %s39_s17 = ssub.s32 %s1285_s22, %s1578_s15  ;;  %s962_s24 = sshll.u32 %s234_s16, 6 }
  0x24   : > { %p42_p9 = scmp.eq.s32.totalorder %s39_s17, 0  ;;  %s976_s25 = sshll.u32 %s1285_s22, 6 }
  0x25   : > { %s244_s9 = scalar_lea.hbm %s1548_s0, %s976_s25  ;;  %s238_s12 = scalar_lea.vmem [#allocation3], %s962_s24 }
  0x26   : > { %s1438_s27 = scalar_select %p42_p9, %s1277_s20, %s44_s10  }
  0x27   : > { %s247_s13 = sshll.u32 %s238_s12, 4  ;;  %s245_s7 = sshll.u32 %s244_s9, 4  ;;  %s248_s13 = int_to_ptr.vmem [resolvable:$true] %s247_s13  ;;  %s246_s7 = int_to_ptr.hbm [resolvable:$true] %s245_s7 }
  0x28   : > { %p1004_p2 = pnand %p1014_p5, %p1429_p7  ;;  %s235_s1 = scalar_lea.sflag [#allocation4], %s234_s16 }
  0x29   : > { %s1570_s2 = smov 8   ;;  %s1571_s3 = smov 128  }
  0x2a   : > { %1006 = dma.hbm_to_vmem [thread:$0]  (!%p1004_p2), %s246_s7, 1024, %s248_s13, %s235_s1, %s1571_s3, %s1571_s3, %s1570_s2  }
  0x2b   : > { %259 = sbr.rel (%p1387_p8) target bundleno = 699 (0x2bb), region = 40  ;;  %s1453_s10 = sand.u32 (!%p1387_p8), 1, %s1273_s19  }
  0x2c   : > { %s966_s17 = sshll.u32 (!%p1387_p8), %s1453_s10, 6  ;;  %s262_s24 = scalar_lea.sflag (!%p1387_p8), [#allocation4], %s1453_s10 }
  0x2d   : > { %s265_s25 = scalar_lea.vmem (!%p1387_p8), [#allocation3], %s966_s17 }
  0x30   : > { %1252 = dma.done.wait (%p1374_p4), %s262_s24, 1024  }
  0x31   : > { %1254 = vsyncadd (%p1374_p4), %s262_s24, 4294966272 }
  0x32   : > { %1256 = dma.done.wait (%p1364_p1), [#allocation7], 4160  }
  0x33   : > { %1258 = vsyncadd (%p1364_p1), [#allocation7], 4294963136 }
  0x34   : > { %1260 = dma.done.wait (%p1364_p1), [#allocation10], 8192  }
  0x35   : > { %1262 = vsyncadd (%p1364_p1), [#allocation10], 4294959104  ;;  %vm322_vm0 = vcmask 523264   ;;  %v313_v0 = vld [vmem:[%s265_s25] sm:$0xff]  ;;  %v315_v1 = vld [vmem:[%s265_s25 + $0x10] sm:$0xff]  ;;  %v1298_v16 = vmov 0   ;;  %s846_s28 = scalar_lea.hbm %s1553_s5, %s1281_s21 }
  0x36   : > { %v323_v2 = vsel %vm322_vm0, %v313_v0, 0.0  ;;  %v329_v3 = vsel %vm322_vm0, %v315_v1, 0.0  ;;  %v317_v4 = vld [vmem:[%s265_s25 + $0x20] sm:$0xff]  ;;  %v314_v6 = vld [vmem:[%s265_s25 + $0x8] sm:$0xff]  ;;  %v316_v7 = vld [vmem:[%s265_s25 + $0x18] sm:$0xff]  ;;  %1076 = vset.pattern.permute.xlu2 %v1298_v16  ;;  %1077 = vset.pattern.permute.xlu0 %v1298_v16  ;;  %vm311_vm1 = vcmask 516096  }
  0x37   : > { %324 = vadd.xlane.f32.xlu0 %v323_v2  ;;  %330 = vadd.xlane.f32.xlu1 %v329_v3  ;;  %v335_v5 = vsel %vm322_vm0, %v317_v4, 0.0  ;;  %v318_v8 = vld [vmem:[%s265_s25 + $0x28] sm:$0xff]  ;;  %v326_v9 = vsel %vm322_vm0, %v314_v6, 0.0  ;;  %v332_v10 = vsel %vm322_vm0, %v316_v7, 0.0  ;;  %v319_v12 = vld [vmem:[%s265_s25 + $0x30] sm:$0xff]  ;;  %v320_v13 = vld [vmem:[%s265_s25 + $0x38] sm:$0xff] }
  0x38   : > { %336 = vadd.xlane.f32.xlu2 %v335_v5  ;;  %v338_v11 = vsel %vm322_vm0, %v318_v8, 0.0  ;;  %v341_v14 = vsel %vm322_vm0, %v319_v12, 0.0  ;;  %v344_v15 = vsel %vm322_vm0, %v320_v13, 0.0  ;;  %1078 = vset.pattern.permute.xlu1 %v1298_v16  ;;  %vm527_vm2 = vcmask 130112   ;;  %s306_s8 = scalar_lea.vmem [#allocation11], %s1453_s10  ;;  %s850_s7 = sshll.u32 %s846_s28, 4  ;;  %s851_s7 = int_to_ptr.hbm [resolvable:$true] %s850_s7 }
  0x39   : > { %vm531_vm3 = vcmask 195712   ;;  %vm535_vm4 = vcmask 261312   ;;  %vm539_vm5 = vcmask 326912   ;;  %vm543_vm6 = vcmask 392512   ;;  %s848_s13 = sshll.u32 %s306_s8, 4  ;;  %s838_s11 = scalar_lea.sflag [#allocation5], %s1453_s10  ;;  %s849_s13 = int_to_ptr.vmem [resolvable:$true] %s848_s13 }
  0x3a   : > { %vm547_vm7 = vcmask 458112   ;;  %vm551_vm8 = vcmask 523712   ;;  %s1213_s16 = sshra.s32 %s851_s7, 4  ;;  %s1219_s9 = scalar_lea.hbm %s1553_s5, 2  ;;  %s1214_s16 = int_to_ptr.hbm [resolvable:$true] %s1213_s16 }
  0x3b   : > { %s1215_s30 = scalar_lea.hbm %s1214_s16, 1  ;;  %p1220_p10 = scmp.lt.s32.totalorder %s1214_s16, %s1553_s5 }
  0x3c   : > { %p1216_p1 = scmp.ne.s32.totalorder %s1214_s16, %s1215_s30  ;;  %p1221_p12 = scmp.lt.s32.totalorder %s1219_s9, %s1215_s30 }
  0x3e   : > { %p1217_p4 = pnand %p1216_p1, %p1422_p3  ;;  %p1222_p13 = por %p1221_p12, %p1220_p10 }
  0x3f   : > { %327 = vadd.xlane.f32.xlu0 %v326_v9  ;;  %333 = vadd.xlane.f32.xlu1 %v332_v10 }
  0x40   : > { %339 = vadd.xlane.f32.xlu2 %v338_v11  ;;  %p1218_p8 = pneg %p1217_p4 }
  0x42   : > { %p1223_p0 = pnand %p1222_p13, %p1218_p8 }
  0x47   : > { %342 = vadd.xlane.f32.xlu0 %v341_v14  ;;  %345 = vadd.xlane.f32.xlu1 %v344_v15 }
  0xaa   : > { %v325_v17 = vpop.xlane.xlu0 %324  ;;  %v331_v36 = vpop.xlane.xlu1 %330 }
  0xab   : > { %v355_v18 = vperm.slane %v325_v17, 0  ;;  %v356_v19 = vperm.slane %v325_v17, 1  ;;  %v357_v20 = vperm.slane %v325_v17, 2  ;;  %v358_v21 = vperm.slane %v325_v17, 3  ;;  %v337_v56 = vpop.xlane.xlu2 %336 }
  0xac   : > { %v359_v22 = vperm.slane %v325_v17, 4  ;;  %v360_v23 = vperm.slane %v325_v17, 5  ;;  %v361_v24 = vperm.slane %v325_v17, 6  ;;  %v362_v25 = vperm.slane %v325_v17, 7 }
  0xad   : > { %419 = vst [vmem:[#allocation1] ss:$9 sm:$0xff] %v355_v18  ;;  %v371_v37 = vperm.slane %v331_v36, 0  ;;  %v372_v38 = vperm.slane %v331_v36, 1  ;;  %v373_v39 = vperm.slane %v331_v36, 2  ;;  %v374_v41 = vperm.slane %v331_v36, 3 }
  0xae   : > { %421 = vst [vmem:[#allocation1 + $0x1] ss:$9 sm:$0xff] %v356_v19  ;;  %v375_v42 = vperm.slane %v331_v36, 4  ;;  %v376_v43 = vperm.slane %v331_v36, 5  ;;  %v377_v44 = vperm.slane %v331_v36, 6  ;;  %v378_v45 = vperm.slane %v331_v36, 7 }
  0xaf   : > { %423 = vst [vmem:[#allocation1 + $0x2] ss:$9 sm:$0xff] %v357_v20  ;;  %v387_v57 = vperm.slane %v337_v56, 0  ;;  %v388_v58 = vperm.slane %v337_v56, 1  ;;  %v389_v59 = vperm.slane %v337_v56, 2  ;;  %v390_v61 = vperm.slane %v337_v56, 3 }
  0xb0   : > { %425 = vst [vmem:[#allocation1 + $0x3] ss:$9 sm:$0xff] %v358_v21  ;;  %v391_v62 = vperm.slane %v337_v56, 4  ;;  %v392_v63 = vperm.slane %v337_v56, 5  ;;  %v393_v0 = vperm.slane %v337_v56, 6  ;;  %v394_v1 = vperm.slane %v337_v56, 7 }
  0xb1   : > { %427 = vst [vmem:[#allocation1 + $0x4] ss:$9 sm:$0xff] %v359_v22  ;;  %v592_v36 = vld [vmem:[#allocation6 + $0xf0] sm:$0xff]  ;;  %v522_v56 = vlaneseq }
  0xb2   : > { %429 = vst [vmem:[#allocation1 + $0x5] ss:$9 sm:$0xff] %v360_v23  ;;  %v328_v26 = vpop.xlane.xlu0 %327  ;;  %v334_v46 = vpop.xlane.xlu1 %333  ;;  %655 = vmatpush.msra.mxu2 %v592_v36  ;;  %v735_v36 = vld [vmem:[#allocation9 + $0x160] sm:$0xff] }
  0xb3   : > { %431 = vst [vmem:[#allocation1 + $0x6] ss:$9 sm:$0xff] %v361_v24  ;;  %v363_v27 = vperm.slane %v328_v26, 0  ;;  %v364_v28 = vperm.slane %v328_v26, 1  ;;  %v365_v29 = vperm.slane %v328_v26, 2  ;;  %v366_v31 = vperm.slane %v328_v26, 3  ;;  %v340_v2 = vpop.xlane.xlu2 %339 }
  0xb4   : > { %433 = vst [vmem:[#allocation1 + $0x7] ss:$9 sm:$0xff] %v362_v25  ;;  %v367_v32 = vperm.slane %v328_v26, 4  ;;  %v368_v33 = vperm.slane %v328_v26, 5  ;;  %v369_v34 = vperm.slane %v328_v26, 6  ;;  %v370_v35 = vperm.slane %v328_v26, 7 }
  0xb5   : > { %v379_v47 = vperm.slane %v334_v46, 0  ;;  %v380_v48 = vperm.slane %v334_v46, 1  ;;  %v381_v49 = vperm.slane %v334_v46, 2  ;;  %v382_v51 = vperm.slane %v334_v46, 3 }
  0xb6   : > { %v383_v52 = vperm.slane %v334_v46, 4  ;;  %v384_v53 = vperm.slane %v334_v46, 5  ;;  %v385_v54 = vperm.slane %v334_v46, 6  ;;  %v386_v55 = vperm.slane %v334_v46, 7  ;;  %v585_v46 = vld [vmem:[#allocation6 + $0xb8] sm:$0xff] }
  0xb7   : > { %v395_v3 = vperm.slane %v340_v2, 0  ;;  %v396_v4 = vperm.slane %v340_v2, 1  ;;  %v397_v5 = vperm.slane %v340_v2, 2  ;;  %v398_v7 = vperm.slane %v340_v2, 3 }
  0xb8   : > { %v399_v8 = vperm.slane %v340_v2, 4  ;;  %v400_v9 = vperm.slane %v340_v2, 5  ;;  %v401_v10 = vperm.slane %v340_v2, 6  ;;  %v402_v11 = vperm.slane %v340_v2, 7  ;;  %v563_v2 = vld [vmem:[#allocation6 + $0x8] sm:$0xff] }
  0xba   : > { %v343_v12 = vpop.xlane.xlu0 %342  ;;  %v346_v22 = vpop.xlane.xlu1 %345 }
  0xbb   : > { %v434_v30 = vld [vmem:[#allocation1] sm:$0xff]  ;;  %v403_v13 = vperm.slane %v343_v12, 0  ;;  %v404_v14 = vperm.slane %v343_v12, 1  ;;  %v405_v15 = vperm.slane %v343_v12, 2  ;;  %v406_v16 = vperm.slane %v343_v12, 3 }
  0xbc   : > { %435 = vst [vmem:[#allocation1] ss:$9 sm:$0xff] %v363_v27  ;;  %499 = vperm.xlu2 %1076, %v434_v30   ;;  %v407_v18 = vperm.slane %v343_v12, 4  ;;  %v408_v19 = vperm.slane %v343_v12, 5  ;;  %v409_v20 = vperm.slane %v343_v12, 6  ;;  %v410_v21 = vperm.slane %v343_v12, 7 }
  0xbd   : > { %436 = vst [vmem:[#allocation1 + $0x1] ss:$9 sm:$0xff] %v364_v28  ;;  %v411_v23 = vperm.slane %v346_v22, 0  ;;  %v412_v24 = vperm.slane %v346_v22, 1  ;;  %v413_v25 = vperm.slane %v346_v22, 2  ;;  %v414_v26 = vperm.slane %v346_v22, 3 }
  0xbe   : > { %437 = vst [vmem:[#allocation1 + $0x2] ss:$9 sm:$0xff] %v365_v29  ;;  %v415_v28 = vperm.slane %v346_v22, 4  ;;  %v416_v29 = vperm.slane %v346_v22, 5  ;;  %v417_v30 = vperm.slane %v346_v22, 6  ;;  %v705_v12 = vld [vmem:[#allocation9 + $0x70] sm:$0xff] }
  0xbf   : > { %438 = vst [vmem:[#allocation1 + $0x3] ss:$9 sm:$0xff] %v366_v31  ;;  %v418_v31 = vperm.slane %v346_v22, 7 }
  0xc0   : > { %439 = vst [vmem:[#allocation1 + $0x4] ss:$9 sm:$0xff] %v367_v32 }
  0xc1   : > { %440 = vst [vmem:[#allocation1 + $0x5] ss:$9 sm:$0xff] %v368_v33  ;;  %v1299_v33 = vmov 0.0  }
  0xc2   : > { %441 = vst [vmem:[#allocation1 + $0x6] ss:$9 sm:$0xff] %v369_v34  ;;  %v590_v34 = vld [vmem:[#allocation6 + $0xe0] sm:$0xff] }
  0xc3   : > { %442 = vst [vmem:[#allocation1 + $0x7] ss:$9 sm:$0xff] %v370_v35  ;;  %v591_v35 = vld [vmem:[#allocation6 + $0xe8] sm:$0xff]  ;;  %615 = vmatpush.msra.mxu0 %v590_v34 }
  0xc4   : > { %312 = vst.msk [vmem:[#allocation2] sm:$0x1] %vm311_vm1, %v1299_v33  ;;  %635 = vmatpush.msra.mxu1 %v591_v35 }
  0xca   : > { %v443_v40 = vld [vmem:[#allocation1] sm:$0xff] }
  0xcb   : > { %444 = vst [vmem:[#allocation1] ss:$9 sm:$0xff] %v371_v37  ;;  %502 = vperm.xlu0 %1077, %v443_v40   ;;  %v593_v37 = vld [vmem:[#allocation6 + $0xf8] sm:$0xff]  ;;  %v588_v40 = vld [vmem:[#allocation6 + $0xd0] sm:$0xff] }
  0xcc   : > { %445 = vst [vmem:[#allocation1 + $0x1] ss:$9 sm:$0xff] %v372_v38  ;;  %675 = vmatpush.msra.mxu3 %v593_v37  ;;  %v586_v38 = vld [vmem:[#allocation6 + $0xc0] sm:$0xff]  ;;  %656 = vmatpush.msra.mxu2 %v588_v40  ;;  %v717_v40 = vld [vmem:[#allocation9 + $0xd0] sm:$0xff] }
  0xcd   : > { %446 = vst [vmem:[#allocation1 + $0x2] ss:$9 sm:$0xff] %v373_v39  ;;  %v587_v39 = vld [vmem:[#allocation6 + $0xc8] sm:$0xff]  ;;  %616 = vmatpush.msra.mxu0 %v586_v38 }
  0xce   : > { %447 = vst [vmem:[#allocation1 + $0x3] ss:$9 sm:$0xff] %v374_v41  ;;  %636 = vmatpush.msra.mxu1 %v587_v39  ;;  %v751_v37 = vld [vmem:[#allocation9 + $0x1e0] sm:$0xff]  ;;  %v701_v39 = vld [vmem:[#allocation9 + $0x50] sm:$0xff] }
  0xcf   : > { %448 = vst [vmem:[#allocation1 + $0x4] ss:$9 sm:$0xff] %v375_v42  ;;  %v589_v42 = vld [vmem:[#allocation6 + $0xd8] sm:$0xff] }
  0xd0   : > { %449 = vst [vmem:[#allocation1 + $0x5] ss:$9 sm:$0xff] %v376_v43  ;;  %676 = vmatpush.msra.mxu3 %v589_v42  ;;  %v582_v43 = vld [vmem:[#allocation6 + $0xa0] sm:$0xff] }
  0xd1   : > { %450 = vst [vmem:[#allocation1 + $0x6] ss:$9 sm:$0xff] %v377_v44  ;;  %v583_v44 = vld [vmem:[#allocation6 + $0xa8] sm:$0xff]  ;;  %617 = vmatpush.msra.mxu0 %v582_v43  ;;  %v750_v42 = vld [vmem:[#allocation9 + $0x1d8] sm:$0xff] }
  0xd2   : > { %451 = vst [vmem:[#allocation1 + $0x7] ss:$9 sm:$0xff] %v378_v45  ;;  %v584_v45 = vld [vmem:[#allocation6 + $0xb0] sm:$0xff]  ;;  %637 = vmatpush.msra.mxu1 %v583_v44  ;;  %677 = vmatpush.msra.mxu3 %v585_v46 }
  0xd3   : > { %657 = vmatpush.msra.mxu2 %v584_v45  ;;  %v700_v45 = vld [vmem:[#allocation9 + $0x48] sm:$0xff] }
  0xd4   : > { %v716_v46 = vld [vmem:[#allocation9 + $0xc8] sm:$0xff] }
  0xd9   : > { %v452_v50 = vld [vmem:[#allocation1] sm:$0xff] }
  0xda   : > { %453 = vst [vmem:[#allocation1] ss:$9 sm:$0xff] %v379_v47  ;;  %505 = vperm.xlu1 %1078, %v452_v50   ;;  %v578_v47 = vld [vmem:[#allocation6 + $0x80] sm:$0xff]  ;;  %v581_v50 = vld [vmem:[#allocation6 + $0x98] sm:$0xff] }
  0xdb   : > { %454 = vst [vmem:[#allocation1 + $0x1] ss:$9 sm:$0xff] %v380_v48  ;;  %v579_v48 = vld [vmem:[#allocation6 + $0x88] sm:$0xff]  ;;  %618 = vmatpush.msra.mxu0 %v578_v47  ;;  %678 = vmatpush.msra.mxu3 %v581_v50  ;;  %v749_v50 = vld [vmem:[#allocation9 + $0x1d0] sm:$0xff] }
  0xdc   : > { %455 = vst [vmem:[#allocation1 + $0x2] ss:$9 sm:$0xff] %v381_v49  ;;  %v580_v49 = vld [vmem:[#allocation6 + $0x90] sm:$0xff]  ;;  %638 = vmatpush.msra.mxu1 %v579_v48 }
  0xdd   : > { %456 = vst [vmem:[#allocation1 + $0x3] ss:$9 sm:$0xff] %v382_v51  ;;  %v574_v51 = vld [vmem:[#allocation6 + $0x60] sm:$0xff]  ;;  %658 = vmatpush.msra.mxu2 %v580_v49  ;;  %v733_v49 = vld [vmem:[#allocation9 + $0x150] sm:$0xff] }
  0xde   : > { %457 = vst [vmem:[#allocation1 + $0x4] ss:$9 sm:$0xff] %v383_v52  ;;  %v575_v52 = vld [vmem:[#allocation6 + $0x68] sm:$0xff]  ;;  %619 = vmatpush.msra.mxu0 %v574_v51 }
  0xdf   : > { %458 = vst [vmem:[#allocation1 + $0x5] ss:$9 sm:$0xff] %v384_v53  ;;  %v576_v53 = vld [vmem:[#allocation6 + $0x70] sm:$0xff]  ;;  %639 = vmatpush.msra.mxu1 %v575_v52 }
  0xe0   : > { %459 = vst [vmem:[#allocation1 + $0x6] ss:$9 sm:$0xff] %v385_v54  ;;  %v577_v54 = vld [vmem:[#allocation6 + $0x78] sm:$0xff]  ;;  %659 = vmatpush.msra.mxu2 %v576_v53  ;;  %v699_v53 = vld [vmem:[#allocation9 + $0x40] sm:$0xff] }
  0xe1   : > { %460 = vst [vmem:[#allocation1 + $0x7] ss:$9 sm:$0xff] %v386_v55  ;;  %v570_v55 = vld [vmem:[#allocation6 + $0x40] sm:$0xff]  ;;  %679 = vmatpush.msra.mxu3 %v577_v54 }
  0xe2   : > { %620 = vmatpush.msra.mxu0 %v570_v55  ;;  %v715_v54 = vld [vmem:[#allocation9 + $0xc0] sm:$0xff] }
  0xe8   : > { %v461_v60 = vld [vmem:[#allocation1] sm:$0xff] }
  0xe9   : > { %462 = vst [vmem:[#allocation1] ss:$9 sm:$0xff] %v387_v57  ;;  %508 = vperm.xlu2 %1076, %v461_v60   ;;  %v571_v57 = vld [vmem:[#allocation6 + $0x48] sm:$0xff]  ;;  %v566_v60 = vld [vmem:[#allocation6 + $0x20] sm:$0xff] }
  0xea   : > { %463 = vst [vmem:[#allocation1 + $0x1] ss:$9 sm:$0xff] %v388_v58  ;;  %v572_v58 = vld [vmem:[#allocation6 + $0x50] sm:$0xff]  ;;  %640 = vmatpush.msra.mxu1 %v571_v57  ;;  %621 = vmatpush.msra.mxu0 %v566_v60  ;;  %v714_v60 = vld [vmem:[#allocation9 + $0xb8] sm:$0xff] }
  0xeb   : > { %464 = vst [vmem:[#allocation1 + $0x2] ss:$9 sm:$0xff] %v389_v59  ;;  %v573_v59 = vld [vmem:[#allocation6 + $0x58] sm:$0xff]  ;;  %660 = vmatpush.msra.mxu2 %v572_v58  ;;  %v748_v57 = vld [vmem:[#allocation9 + $0x1c8] sm:$0xff] }
  0xec   : > { %465 = vst [vmem:[#allocation1 + $0x3] ss:$9 sm:$0xff] %v390_v61  ;;  %v567_v61 = vld [vmem:[#allocation6 + $0x28] sm:$0xff]  ;;  %680 = vmatpush.msra.mxu3 %v573_v59  ;;  %v698_v59 = vld [vmem:[#allocation9 + $0x38] sm:$0xff] }
  0xed   : > { %466 = vst [vmem:[#allocation1 + $0x4] ss:$9 sm:$0xff] %v391_v62  ;;  %641 = vmatpush.msra.mxu1 %v567_v61 }
  0xee   : > { %467 = vst [vmem:[#allocation1 + $0x5] ss:$9 sm:$0xff] %v392_v63  ;;  %v568_v63 = vld [vmem:[#allocation6 + $0x30] sm:$0xff] }
  0xef   : > { %468 = vst [vmem:[#allocation1 + $0x6] ss:$9 sm:$0xff] %v393_v0  ;;  %v569_v0 = vld [vmem:[#allocation6 + $0x38] sm:$0xff]  ;;  %661 = vmatpush.msra.mxu2 %v568_v63  ;;  %642 = vmatpush.msra.mxu1 %v563_v2  ;;  %v731_v63 = vld [vmem:[#allocation9 + $0x140] sm:$0xff] }
  0xf0   : > { %469 = vst [vmem:[#allocation1 + $0x7] ss:$9 sm:$0xff] %v394_v1  ;;  %v562_v1 = vld [vmem:[#allocation6] sm:$0xff]  ;;  %681 = vmatpush.msra.mxu3 %v569_v0 }
  0xf1   : > { %622 = vmatpush.msra.mxu0 %v562_v1  ;;  %v747_v0 = vld [vmem:[#allocation9 + $0x1c0] sm:$0xff]  ;;  %v321_v1 = vld [vmem:[#allocation2] sm:$0x1] }
  0xf7   : > { %v470_v6 = vld [vmem:[#allocation1] sm:$0xff] }
  0xf8   : > { %471 = vst [vmem:[#allocation1] ss:$9 sm:$0xff] %v395_v3  ;;  %511 = vperm.xlu2 %1076, %v470_v6   ;;  %v1482_v3 = vand.u32 127, %v522_v56  ;;  %v732_v56 = vld [vmem:[#allocation9 + $0x148] sm:$0xff] }
  0xf9   : > { %472 = vst [vmem:[#allocation1 + $0x1] ss:$9 sm:$0xff] %v396_v4  ;;  %v564_v4 = vld [vmem:[#allocation6 + $0x10] sm:$0xff] }
  0xfa   : > { %473 = vst [vmem:[#allocation1 + $0x2] ss:$9 sm:$0xff] %v397_v5  ;;  %v565_v5 = vld [vmem:[#allocation6 + $0x18] sm:$0xff]  ;;  %v525_v6 = vadd.s32 4294967288, %v1482_v3  ;;  %662 = vmatpush.msra.mxu2 %v564_v4  ;;  %v533_v22 = vadd.s32 4294967272, %v1482_v3  ;;  %v537_v33 = vadd.s32 4294967264, %v1482_v3 }
  0xfb   : > { %474 = vst [vmem:[#allocation1 + $0x3] ss:$9 sm:$0xff] %v398_v7  ;;  %682 = vmatpush.msra.mxu3 %v565_v5  ;;  %v545_v48 = vadd.s32 4294967248, %v1482_v3  ;;  %v549_v52 = vadd.s32 4294967240, %v1482_v3  ;;  %v713_v4 = vld [vmem:[#allocation9 + $0xb0] sm:$0xff] }
  0xfc   : > { %475 = vst [vmem:[#allocation1 + $0x4] ss:$9 sm:$0xff] %v399_v8  ;;  %v529_v8 = vadd.s32 4294967280, %v1482_v3 }
  0xfd   : > { %476 = vst [vmem:[#allocation1 + $0x5] ss:$9 sm:$0xff] %v400_v9 }
  0xfe   : > { %477 = vst [vmem:[#allocation1 + $0x6] ss:$9 sm:$0xff] %v401_v10  ;;  %v706_v10 = vld [vmem:[#allocation9 + $0x78] sm:$0xff] }
  0xff   : > { %478 = vst [vmem:[#allocation1 + $0x7] ss:$9 sm:$0xff] %v402_v11  ;;  %v722_v11 = vld [vmem:[#allocation9 + $0xf8] sm:$0xff]  ;;  %756 = vmatpush.msrb.mxu0 %v706_v10  ;;  %v712_v10 = vld [vmem:[#allocation9 + $0xa8] sm:$0xff] }
 0x100   : > { %776 = vmatpush.msrb.mxu1 %v722_v11 }
 0x101   : > { %757 = vmatpush.msrb.mxu0 %v705_v12  ;;  %v729_v12 = vld [vmem:[#allocation9 + $0x130] sm:$0xff] }
 0x106   : > { %v479_v17 = vld [vmem:[#allocation1] sm:$0xff] }
 0x107   : > { %514 = vperm.xlu1 %1078, %v479_v17   ;;  %480 = vst [vmem:[#allocation1] ss:$9 sm:$0xff] %v403_v13  ;;  %v721_v13 = vld [vmem:[#allocation9 + $0xf0] sm:$0xff]  ;;  %v738_v17 = vld [vmem:[#allocation9 + $0x178] sm:$0xff] }
 0x108   : > { %481 = vst [vmem:[#allocation1 + $0x1] ss:$9 sm:$0xff] %v404_v14  ;;  %777 = vmatpush.msrb.mxu1 %v721_v13  ;;  %796 = vmatpush.msrb.mxu2 %v738_v17  ;;  %v745_v13 = vld [vmem:[#allocation9 + $0x1b0] sm:$0xff]  ;;  %v710_v17 = vld [vmem:[#allocation9 + $0x98] sm:$0xff] }
 0x109   : > { %482 = vst [vmem:[#allocation1 + $0x2] ss:$9 sm:$0xff] %v405_v15  ;;  %v704_v15 = vld [vmem:[#allocation9 + $0x68] sm:$0xff] }
 0x10a   : > { %483 = vst [vmem:[#allocation1 + $0x3] ss:$9 sm:$0xff] %v406_v16  ;;  %v720_v16 = vld [vmem:[#allocation9 + $0xe8] sm:$0xff]  ;;  %758 = vmatpush.msrb.mxu0 %v704_v15  ;;  %v711_v15 = vld [vmem:[#allocation9 + $0xa0] sm:$0xff] }
 0x10b   : > { %484 = vst [vmem:[#allocation1 + $0x4] ss:$9 sm:$0xff] %v407_v18  ;;  %778 = vmatpush.msrb.mxu1 %v720_v16  ;;  %v694_v16 = vld [vmem:[#allocation9 + $0x18] sm:$0xff] }
 0x10c   : > { %485 = vst [vmem:[#allocation1 + $0x5] ss:$9 sm:$0xff] %v408_v19  ;;  %v703_v19 = vld [vmem:[#allocation9 + $0x60] sm:$0xff] }
 0x10d   : > { %486 = vst [vmem:[#allocation1 + $0x6] ss:$9 sm:$0xff] %v409_v20  ;;  %v754_v20 = vld [vmem:[#allocation9 + $0x1f8] sm:$0xff]  ;;  %759 = vmatpush.msrb.mxu0 %v703_v19 }
 0x10e   : > { %487 = vst [vmem:[#allocation1 + $0x7] ss:$9 sm:$0xff] %v410_v21  ;;  %816 = vmatpush.msrb.mxu3 %v754_v20  ;;  %v693_v20 = vld [vmem:[#allocation9 + $0x10] sm:$0xff] }
 0x115   : > { %v488_v27 = vld [vmem:[#allocation1] sm:$0xff] }
 0x116   : > { %517 = vperm.xlu2 %1076, %v488_v27   ;;  %489 = vst [vmem:[#allocation1] ss:$9 sm:$0xff] %v411_v23  ;;  %v1478_v41 = vpop.permute.xlu2 %499  ;;  %v736_v27 = vld [vmem:[#allocation9 + $0x168] sm:$0xff] }
 0x117   : > { %490 = vst [vmem:[#allocation1 + $0x1] ss:$9 sm:$0xff] %v412_v24  ;;  %v524_v21 = vperm.slane %v1478_v41, %v1482_v3  ;;  %v719_v24 = vld [vmem:[#allocation9 + $0xe0] sm:$0xff]  ;;  %v734_v41 = vld [vmem:[#allocation9 + $0x158] sm:$0xff] }
 0x118   : > { %491 = vst [vmem:[#allocation1 + $0x2] ss:$9 sm:$0xff] %v413_v25  ;;  %v737_v25 = vld [vmem:[#allocation9 + $0x170] sm:$0xff]  ;;  %779 = vmatpush.msrb.mxu1 %v719_v24  ;;  %v692_v24 = vld [vmem:[#allocation9 + $0x8] sm:$0xff] }
 0x119   : > { %492 = vst [vmem:[#allocation1 + $0x3] ss:$9 sm:$0xff] %v414_v26  ;;  %v753_v26 = vld [vmem:[#allocation9 + $0x1f0] sm:$0xff]  ;;  %797 = vmatpush.msrb.mxu2 %v737_v25  ;;  %v708_v25 = vld [vmem:[#allocation9 + $0x88] sm:$0xff] }
 0x11a   : > { %493 = vst [vmem:[#allocation1 + $0x4] ss:$9 sm:$0xff] %v415_v28  ;;  %v752_v28 = vld [vmem:[#allocation9 + $0x1e8] sm:$0xff]  ;;  %817 = vmatpush.msrb.mxu3 %v753_v26  ;;  %v727_v26 = vld [vmem:[#allocation9 + $0x120] sm:$0xff] }
 0x11b   : > { %494 = vst [vmem:[#allocation1 + $0x5] ss:$9 sm:$0xff] %v416_v29  ;;  %798 = vmatpush.msrb.mxu2 %v736_v27  ;;  %v743_v27 = vld [vmem:[#allocation9 + $0x1a0] sm:$0xff] }
 0x11c   : > { %495 = vst [vmem:[#allocation1 + $0x6] ss:$9 sm:$0xff] %v417_v30  ;;  %v541_v30 = vadd.s32 4294967256, %v1482_v3  ;;  %818 = vmatpush.msrb.mxu3 %v752_v28  ;;  %v697_v3 = vld [vmem:[#allocation9 + $0x30] sm:$0xff]  ;;  %v691_v28 = vld [vmem:[#allocation9] sm:$0xff] }
 0x11d   : > { %496 = vst [vmem:[#allocation1 + $0x7] ss:$9 sm:$0xff] %v418_v31  ;;  %v702_v31 = vld [vmem:[#allocation9 + $0x58] sm:$0xff]  ;;  %799 = vmatpush.msrb.mxu2 %v735_v36  ;;  %v723_v36 = vld [vmem:[#allocation9 + $0x100] sm:$0xff] }
 0x11e   : > { %760 = vmatpush.msrb.mxu0 %v702_v31  ;;  %819 = vmatpush.msrb.mxu3 %v751_v37  ;;  %v742_v31 = vld [vmem:[#allocation9 + $0x198] sm:$0xff]  ;;  %v739_v37 = vld [vmem:[#allocation9 + $0x180] sm:$0xff] }
 0x11f   : > { %800 = vmatpush.msrb.mxu2 %v734_v41 }
 0x120   : > { %761 = vmatpush.msrb.mxu0 %v701_v39  ;;  %820 = vmatpush.msrb.mxu3 %v750_v42 }
 0x121   : > { %801 = vmatpush.msrb.mxu2 %v733_v49 }
 0x122   : > { %762 = vmatpush.msrb.mxu0 %v700_v45  ;;  %821 = vmatpush.msrb.mxu3 %v749_v50 }
 0x123   : > { %802 = vmatpush.msrb.mxu2 %v732_v56 }
 0x124   : > { %v497_v32 = vld [vmem:[#allocation1] sm:$0xff]  ;;  %763 = vmatpush.msrb.mxu0 %v699_v53  ;;  %822 = vmatpush.msrb.mxu3 %v748_v57 }
 0x125   : > { %520 = vperm.xlu1 %1078, %v497_v32   ;;  %v718_v32 = vld [vmem:[#allocation9 + $0xd8] sm:$0xff]  ;;  %803 = vmatpush.msrb.mxu2 %v731_v63 }
 0x126   : > { %780 = vmatpush.msrb.mxu1 %v718_v32  ;;  %764 = vmatpush.msrb.mxu0 %v698_v59  ;;  %v725_v32 = vld [vmem:[#allocation9 + $0x110] sm:$0xff] }
 0x127   : > { %823 = vmatpush.msrb.mxu3 %v747_v0 }
 0x128   : > { %781 = vmatpush.msrb.mxu1 %v717_v40  ;;  %765 = vmatpush.msrb.mxu0 %v697_v3 }
 0x12a   : > { %782 = vmatpush.msrb.mxu1 %v716_v46 }
 0x12c   : > { %783 = vmatpush.msrb.mxu1 %v715_v54 }
 0x12e   : > { %784 = vmatpush.msrb.mxu1 %v714_v60 }
 0x130   : > { %785 = vmatpush.msrb.mxu1 %v713_v4 }
 0x132   : > { %786 = vmatpush.msrb.mxu1 %v712_v10 }
 0x134   : > { %787 = vmatpush.msrb.mxu1 %v711_v15 }
 0x136   : > { %788 = vmatpush.msrb.mxu1 %v710_v17 }
 0x13d   : > { %v503_v7 = vpop.permute.xlu0 %502 }
 0x13e   : > { %v526_v14 = vperm.slane %v503_v7, %v525_v6  ;;  %v730_v6 = vld [vmem:[#allocation9 + $0x138] sm:$0xff] }
 0x13f   : > { %v746_v7 = vld [vmem:[#allocation9 + $0x1b8] sm:$0xff]  ;;  %804 = vmatpush.msrb.mxu2 %v730_v6 }
 0x140   : > { %v528_v29 = vsel %vm527_vm2, %v526_v14, %v524_v21  ;;  %v695_v14 = vld [vmem:[#allocation9 + $0x20] sm:$0xff]  ;;  %824 = vmatpush.msrb.mxu3 %v746_v7  ;;  %v709_v21 = vld [vmem:[#allocation9 + $0x90] sm:$0xff] }
 0x141   : > { %805 = vmatpush.msrb.mxu2 %v729_v12  ;;  %789 = vmatpush.msrb.mxu1 %v709_v21 }
 0x142   : > { %825 = vmatpush.msrb.mxu3 %v745_v13 }
 0x143   : > { %v1480_v62 = vpop.permute.xlu2 %508  ;;  %790 = vmatpush.msrb.mxu1 %v708_v25 }
 0x144   : > { %v534_v38 = vperm.slane %v1480_v62, %v533_v22  ;;  %v728_v22 = vld [vmem:[#allocation9 + $0x128] sm:$0xff] }
 0x145   : > { %806 = vmatpush.msrb.mxu2 %v728_v22 }
 0x147   : > { %807 = vmatpush.msrb.mxu2 %v727_v26 }
 0x14c   : > { %v506_v9 = vpop.permute.xlu1 %505 }
 0x14d   : > { %v530_v18 = vperm.slane %v506_v9, %v529_v8  ;;  %v696_v9 = vld [vmem:[#allocation9 + $0x28] sm:$0xff] }
 0x14e   : > { %766 = vmatpush.msrb.mxu0 %v696_v9 }
 0x14f   : > { %v532_v34 = vsel %vm531_vm3, %v530_v18, %v528_v29  ;;  %v707_v29 = vld [vmem:[#allocation9 + $0x80] sm:$0xff] }
 0x150   : > { %v536_v43 = vsel %vm535_vm4, %v534_v38, %v532_v34  ;;  %767 = vmatpush.msrb.mxu0 %v695_v14  ;;  %791 = vmatpush.msrb.mxu1 %v707_v29  ;;  %v724_v34 = vld [vmem:[#allocation9 + $0x108] sm:$0xff]  ;;  %v594_v38 = vld [vmem:[#allocation8] sm:$0xf] }
 0x151   : > { %v596_v39 = vperm.slane %v594_v38, 0  ;;  %v597_v40 = vperm.slane %v594_v38, 1 }
 0x152   : > { %v512_v23 = vpop.permute.xlu2 %511  ;;  %768 = vmatpush.msrb.mxu0 %v694_v16 }
 0x153   : > { %v538_v47 = vperm.slane %v512_v23, %v537_v33  ;;  %v744_v23 = vld [vmem:[#allocation9 + $0x1a8] sm:$0xff]  ;;  %v741_v33 = vld [vmem:[#allocation9 + $0x190] sm:$0xff] }
 0x154   : > { %769 = vmatpush.msrb.mxu0 %v693_v20  ;;  %826 = vmatpush.msrb.mxu3 %v744_v23 }
 0x155   : > { %v540_v55 = vsel %vm539_vm5, %v538_v47, %v536_v43  ;;  %v598_v47 = vperm.slane %v594_v38, 2 }
 0x156   : > { %770 = vmatpush.msrb.mxu0 %v692_v24  ;;  %827 = vmatpush.msrb.mxu3 %v743_v27 }
 0x158   : > { %771 = vmatpush.msrb.mxu0 %v691_v28  ;;  %828 = vmatpush.msrb.mxu3 %v742_v31 }
 0x15a   : > { %829 = vmatpush.msrb.mxu3 %v741_v33 }
 0x170   : > { %v518_v51 = vpop.permute.xlu2 %517 }
 0x171   : > { %v546_v61 = vperm.slane %v518_v51, %v545_v48  ;;  %v599_v48 = vperm.slane %v594_v38, 3 }
 0x179   : > { %v515_v35 = vpop.permute.xlu1 %514 }
 0x17a   : > { %v542_v44 = vperm.slane %v515_v35, %v541_v30  ;;  %v726_v30 = vld [vmem:[#allocation9 + $0x118] sm:$0xff]  ;;  %v740_v35 = vld [vmem:[#allocation9 + $0x188] sm:$0xff] }
 0x17b   : > { %808 = vmatpush.msrb.mxu2 %v726_v30  ;;  %830 = vmatpush.msrb.mxu3 %v740_v35 }
 0x17c   : > { %v544_v58 = vsel %vm543_vm6, %v542_v44, %v540_v55  ;;  %v755_v55 = vld [vmem:[%s1552_s4] sm:$0x1] }
 0x17d   : > { %v548_v5 = vsel %vm547_vm7, %v546_v61, %v544_v58  ;;  %809 = vmatpush.msrb.mxu2 %v725_v32  ;;  %831 = vmatpush.msrb.mxu3 %v739_v37 }
 0x17f   : > { %810 = vmatpush.msrb.mxu2 %v724_v34 }
 0x181   : > { %811 = vmatpush.msrb.mxu2 %v723_v36 }
 0x197   : > { %v521_v62 = vpop.permute.xlu1 %520 }
 0x198   : > { %v550_v2 = vperm.slane %v521_v62, %v549_v52 }
 0x19a   : > { %v552_v8 = vsel %vm551_vm8, %v550_v2, %v548_v5 }
 0x19b   : > { %v554_v11 = vadd.f32 %v552_v8, %v321_v1 }
 0x19d   : > { %556 = vst.msk [vmem:[#allocation2] sm:$0x1] %vm311_vm1, %v554_v11 }
 0x1a4   : > { %v560_v18 = vld [vmem:[#allocation2] sm:$0x1] }
 0x1a5   : > { %v561_v19 = vmul.f32 0.015625, %v560_v18 }
 0x1a7   : > { %970 = vmatmul.msk.f32.vlgmr.msra.gmra.mxu0 %vm322_vm0, %v561_v19  ;;  %971 = vmatmul.msk.f32.vlgmr.msra.gmra.mxu1 %vm322_vm0, %v561_v19 }
 0x1a8   : > { %972 = vmatmul.msk.f32.vlgmr.msra.gmra.mxu2 %vm322_vm0, %v561_v19  ;;  %973 = vmatmul.msk.f32.vlgmr.msra.gmra.mxu3 %vm322_vm0, %v561_v19 }
 0x224   : > { %v624_v41 = vpop.f32.mrf.mxu0  ;;  %v644_v42 = vpop.f32.mrf.mxu1 }
 0x225   : > { %v625_v43 = vadd.f32 %v624_v41, %v596_v39  ;;  %v645_v44 = vadd.f32 %v644_v42, %v597_v40 }
 0x227   : > { %v687_v45 = vmax.f32 %v625_v43, 0.0  ;;  %v688_v46 = vmax.f32 %v645_v44, 0.0 }
 0x229   : > { %772 = vmatmul.f32.vlgmr.msrb.gmra.mxu0 %v687_v45  ;;  %792 = vmatmul.f32.vlgmr.msrb.gmra.mxu1 %v688_v46 }
 0x22b   : > { %v664_v49 = vpop.f32.mrf.mxu2  ;;  %v684_v50 = vpop.f32.mrf.mxu3 }
 0x22c   : > { %v665_v51 = vadd.f32 %v664_v49, %v598_v47  ;;  %v685_v52 = vadd.f32 %v684_v50, %v599_v48 }
 0x22e   : > { %v689_v53 = vmax.f32 %v665_v51, 0.0  ;;  %v690_v54 = vmax.f32 %v685_v52, 0.0 }
 0x230   : > { %812 = vmatmul.f32.vlgmr.msrb.gmra.mxu2 %v689_v53  ;;  %832 = vmatmul.f32.vlgmr.msrb.gmra.mxu3 %v690_v54 }
 0x2a6   : > { %v773_v56 = vpop.f32.mrf.mxu0  ;;  %v793_v58 = vpop.f32.mrf.mxu1 }
 0x2a7   : > { %v774_v57 = vadd.f32 %v773_v56, %v755_v55 }
 0x2a9   : > { %v794_v59 = vadd.f32 %v793_v58, %v774_v57 }
 0x2b3   : > { %v813_v60 = vpop.f32.mrf.mxu2  ;;  %v833_v62 = vpop.f32.mrf.mxu3 }
 0x2b4   : > { %v814_v61 = vadd.f32 %v813_v60, %v794_v59 }
 0x2b6   : > { %v834_v63 = vadd.f32 %v833_v62, %v814_v61 }
 0x2b8   : > { %836 = vst [vmem:[%s306_s8] sm:$0x1] %v834_v63 }
 0x2b9   : > { %1226 = shalt.err (!%p1223_p0)
}
 0x2ba   : > { %991 = dma.vmem_to_hbm [thread:$0]  (%p1422_p3), %s849_s13, 16, %s851_s7, %s838_s11  }
 0x2bb PF: > { %s862_s10 = sand.u32 1, %s1269_s18   ;;  %p1008_p5 = pnand %p961_p11, %p1379_p6 }
 0x2bc   : > { %s863_s24 = scalar_lea.sflag [#allocation5], %s862_s10 }
 0x2bd   : > { %p1009_p7 = pneg %p1008_p5 }
 0x2bf   : > { %1264 = dma.done.wait (%p1009_p7), %s863_s24, 16  }
 0x2c0   : > { %1266 = vsyncadd (%p1009_p7), %s863_s24, 4294967280  ;;  %s23_s23 = sadd.s32 1, %s1289_s23   ;;  %s1572_s18 = smov %s1273_s19 }
 0x2c1   : > { %p20_p9 = scmp.ge.s32.totalorder %s23_s23, 4   ;;  %s1573_s19 = smov %s1277_s20 }
 0x2c2   : > { %s1574_s20 = smov %s1438_s27  ;;  %s1575_s21 = smov %s1285_s22 }
 0x2c3   : > { %s1576_s22 = smov %s1578_s15  ;;  %22 = sbr.rel (!%p20_p9) target bundleno = 12 (0xc), region = 112 }
 0x2c8   :  { %868 = vsyncpa [#allocation4], 1 }
 0x2c9   :  { %870 = vsyncpa [#allocation4 + $0x1], 1 }
 0x2ca   :  { %871 = vsyncpa [#allocation7], 1 }
 0x2cb   :  { %872 = vsyncpa [#allocation10], 1 }
 0x2cc   :  { %873 = vsyncpa [#allocation5], 1 }
 0x2cd   :  { %875 = vsyncpa [#allocation5 + $0x1], 1 }

</bundles_post_ra>
